<compile_context>
chip_gen: v6e
topology: v6e:2x2x1
jax: 0.10.0
libtpu: 0.0.40
codegen_flags: <defaults>
</compile_context>

<pallas_src>
import functools

import jax
import jax.numpy as jnp
from jax.experimental import pallas as pl
from jax.experimental.pallas import tpu as pltpu

HIDDEN_SIZE = 10
INPUT_SIZE = HIDDEN_SIZE        # identity residual => in == hidden
D = HIDDEN_SIZE
D_PAD = 16                      # feature rows padded to a multiple of 8 sublanes
DEFAULT_TILE_B = 32768          # batch lanes per grid step (multiple of 128)


def _round_up(n, m):
    return ((n + m - 1) // m) * m


def _residual_block_kernel(x_ref, w1_ref, b1_ref, w2_ref, b2_ref, o_ref):
    # x_ref: (D_PAD, tile_b) f32, feature-major (features on sublanes,
    # batch on lanes).  Weights: (D_PAD, D_PAD) bf16; biases: (D_PAD, 1) f32.
    x = x_ref[...]

    # fc1 + relu  (bf16 operands on the MXU, f32 accumulation)
    h = jnp.dot(w1_ref[...], x.astype(jnp.bfloat16),
                preferred_element_type=jnp.float32) + b1_ref[...]
    h = jnp.maximum(h, 0.0)

    # fc2 + identity residual + relu
    h = jnp.dot(w2_ref[...], h.astype(jnp.bfloat16),
                preferred_element_type=jnp.float32) + b2_ref[...]
    out = jnp.maximum(h + x, 0.0)

    o_ref[...] = out.astype(o_ref.dtype)


def prepare_params(params):
    """One-time pad + cast of PyTorch-layout params to kernel shapes.

    params = (w1, b1, w2, b2) with w*: (out, in) and b*: (out,).
    Returns bf16 (D_PAD, D_PAD) weights and f32 (D_PAD, 1) biases.
    """
    w1, b1, w2, b2 = params

    def pad_w(w):
        wp = jnp.zeros((D_PAD, D_PAD), jnp.float32).at[:D, :D].set(w)
        return wp.astype(jnp.bfloat16)

    def pad_b(b):
        return jnp.zeros((D_PAD, 1), jnp.float32).at[:D, 0].set(b)

    return pad_w(w1), pad_b(b1), pad_w(w2), pad_b(b2)


@functools.partial(jax.jit, static_argnames=("max_tile_b",))
def residual_block_forward(x, fused_params, *, max_tile_b=DEFAULT_TILE_B):
    """x: (B, D) f32 -> (B, D) f32 ;  out = relu(fc2(relu(fc1(x))) + x)."""
    B = x.shape[0]
    w1, b1, w2, b2 = fused_params

    # Adaptive tiling: n_tiles tiles of tile_b lanes each, tile_b a multiple
    # of 128, so B_pad overshoots B by < 128*n_tiles rather than a whole tile.
    n_tiles = max(1, pl.cdiv(B, max_tile_b))
    tile_b = _round_up(pl.cdiv(B, n_tiles), 128)
    B_pad = n_tiles * tile_b

    # Feature-major input (D_PAD, B_pad): the transpose/pad is one cheap fused
    # XLA copy; callers that already keep activations feature-major skip it.
    xt = jnp.pad(x.T, ((0, D_PAD - D), (0, B_pad - B)))

    flops = 2 * 2 * D_PAD * D_PAD * B_pad
    bytes_accessed = (2 * D_PAD * B_pad * 4                   # x + out
                      + (w1.size + w2.size) * 2               # bf16 weights
                      + (b1.size + b2.size) * 4)              # f32 biases

    def whole(p):
        # Whole array as a single block with a constant index -> DMA'd once
        # and kept VMEM-resident across every batch tile.  (Total weight/bias
        # footprint is ~1 KB, so single- vs double-buffering them is moot.)
        return pl.BlockSpec(p.shape, lambda i: (0, 0))

    out_t = pl.pallas_call(
        _residual_block_kernel,
        out_shape=jax.ShapeDtypeStruct((D_PAD, B_pad), jnp.float32),
        grid=(n_tiles,),
        in_specs=[
            pl.BlockSpec((D_PAD, tile_b), lambda i: (0, i)),
            whole(w1), whole(b1), whole(w2), whole(b2),
        ],
        out_specs=pl.BlockSpec((D_PAD, tile_b), lambda i: (0, i)),
        compiler_params=pltpu.CompilerParams(
            dimension_semantics=("parallel",),        # lets v7x use both TCs
            vmem_limit_bytes=32 * 1024 * 1024,        # headroom for big tiles (v5e default is 16 MiB)
        ),
        cost_estimate=pl.CostEstimate(
            flops=flops, transcendentals=0, bytes_accessed=bytes_accessed),
    )(xt, w1, b1, w2, b2)

    # Back to the natural (B, D) layout.
    return out_t[:D, :B].T


def init_params(key):
    """PyTorch-default nn.Linear init: U(-1/sqrt(fan_in), +1/sqrt(fan_in));
    weights in (out, in) layout, biases (out,)."""
    def linear(k, fan_in, fan_out):
        kw, kb = jax.random.split(k)
        bound = 1.0 / jnp.sqrt(jnp.float32(fan_in))
        w = jax.random.uniform(kw, (fan_out, fan_in), jnp.float32, -bound, bound)
        b = jax.random.uniform(kb, (fan_out,), jnp.float32, -bound, bound)
        return w, b

    k1, k2 = jax.random.split(key)
    w1, b1 = linear(k1, INPUT_SIZE, HIDDEN_SIZE)     # fc1
    w2, b2 = linear(k2, HIDDEN_SIZE, HIDDEN_SIZE)    # fc2
    return (w1, b1, w2, b2)


def reference_forward(x, params):
    """Pure-JAX f32 mirror of ResidualBlock.forward."""
    w1, b1, w2, b2 = params
    residual = x
    out = jnp.maximum(x @ w1.T + b1, 0.0)
    out = out @ w2.T + b2
    out = out + residual
    return jnp.maximum(out, 0.0)


if __name__ == "__main__":
    key = jax.random.PRNGKey(0)
    kx, kp = jax.random.split(key)

    batch = 8
    x = jax.random.normal(kx, (batch, INPUT_SIZE), jnp.float32)
    params = init_params(kp)
    fused_params = prepare_params(params)     # one-time pad + bf16 cast

    out = residual_block_forward(x, fused_params)
    out = jax.block_until_ready(out)

    ref = reference_forward(x, params)
    assert out.shape == (batch, HIDDEN_SIZE)
    # bf16 matmul operands (f32 accumulation) => slightly looser tolerance.
    assert jnp.allclose(out, ref, atol=3e-2, rtol=3e-2), "mismatch vs reference"

    print("KERNEL_OK")
</pallas_src>

<mosaic_0001>
module attributes {stable_mosaic.version = 11 : i64} {
  func.func @_residual_block_kernel(%arg0: i32, %arg1: memref<16x128xf32, #tpu.memory_space<vmem>>, %arg2: memref<16x16xbf16, #tpu.memory_space<vmem>>, %arg3: memref<16x1xf32, #tpu.memory_space<vmem>>, %arg4: memref<16x16xbf16, #tpu.memory_space<vmem>>, %arg5: memref<16x1xf32, #tpu.memory_space<vmem>>, %arg6: memref<16x128xf32, #tpu.memory_space<vmem>>) attributes {dimension_semantics = [#tpu.dimension_semantics<parallel>], iteration_bounds = array<i64: 1>, scalar_prefetch = 0 : i64, scratch_operands = 0 : i64, tpu.core_type = #tpu.core_type<tc>, window_params = [{transform_indices = @transform_0, window_bounds = array<i64: 16, 128>}, {pipeline_mode = #tpu.pipeline_mode<synchronous>, transform_indices = @transform_1, window_bounds = array<i64: 16, 16>}, {pipeline_mode = #tpu.pipeline_mode<synchronous>, transform_indices = @transform_2, window_bounds = array<i64: 16, 1>}, {pipeline_mode = #tpu.pipeline_mode<synchronous>, transform_indices = @transform_3, window_bounds = array<i64: 16, 16>}, {pipeline_mode = #tpu.pipeline_mode<synchronous>, transform_indices = @transform_4, window_bounds = array<i64: 16, 1>}, {transform_indices = @transform_5, window_bounds = array<i64: 16, 128>}]} {
    %c0 = arith.constant 0 : index
    %c0_0 = arith.constant 0 : index
    %0 = vector.load %arg1[%c0, %c0_0] : memref<16x128xf32, #tpu.memory_space<vmem>>, vector<16x128xf32>
    %c0_1 = arith.constant 0 : index
    %c0_2 = arith.constant 0 : index
    %1 = vector.load %arg2[%c0_1, %c0_2] : memref<16x16xbf16, #tpu.memory_space<vmem>>, vector<16x16xbf16>
    %2 = arith.truncf %0 : vector<16x128xf32> to vector<16x128xbf16>
    %cst = arith.constant dense<0.000000e+00> : vector<16x128xf32>
    %3 = tpu.matmul %1, %2, %cst {dimension_numbers = #tpu.dot_dimension_numbers<[1], [0], [0], [1], [0, 0, 1, 1], [], []>} : vector<16x16xbf16>, vector<16x128xbf16>, vector<16x128xf32> -> vector<16x128xf32>
    %c0_3 = arith.constant 0 : index
    %c0_4 = arith.constant 0 : index
    %4 = vector.load %arg3[%c0_3, %c0_4] : memref<16x1xf32, #tpu.memory_space<vmem>>, vector<16x1xf32>
    %5 = vector.broadcast %4 : vector<16x1xf32> to vector<16x128xf32>
    %6 = arith.addf %3, %5 : vector<16x128xf32>
    %cst_5 = arith.constant 0.000000e+00 : f32
    %7 = vector.broadcast %cst_5 : f32 to vector<16x128xf32>
    %8 = arith.maximumf %6, %7 : vector<16x128xf32>
    %c0_6 = arith.constant 0 : index
    %c0_7 = arith.constant 0 : index
    %9 = vector.load %arg4[%c0_6, %c0_7] : memref<16x16xbf16, #tpu.memory_space<vmem>>, vector<16x16xbf16>
    %10 = arith.truncf %8 : vector<16x128xf32> to vector<16x128xbf16>
    %cst_8 = arith.constant dense<0.000000e+00> : vector<16x128xf32>
    %11 = tpu.matmul %9, %10, %cst_8 {dimension_numbers = #tpu.dot_dimension_numbers<[1], [0], [0], [1], [0, 0, 1, 1], [], []>} : vector<16x16xbf16>, vector<16x128xbf16>, vector<16x128xf32> -> vector<16x128xf32>
    %c0_9 = arith.constant 0 : index
    %c0_10 = arith.constant 0 : index
    %12 = vector.load %arg5[%c0_9, %c0_10] : memref<16x1xf32, #tpu.memory_space<vmem>>, vector<16x1xf32>
    %13 = vector.broadcast %12 : vector<16x1xf32> to vector<16x128xf32>
    %14 = arith.addf %11, %13 : vector<16x128xf32>
    %15 = arith.addf %14, %0 : vector<16x128xf32>
    %cst_11 = arith.constant 0.000000e+00 : f32
    %16 = vector.broadcast %cst_11 : f32 to vector<16x128xf32>
    %17 = arith.maximumf %15, %16 : vector<16x128xf32>
    %c0_12 = arith.constant 0 : index
    %c0_13 = arith.constant 0 : index
    %18 = vector.load %arg6[%c0_12, %c0_13] : memref<16x128xf32, #tpu.memory_space<vmem>>, vector<16x128xf32>
    tpu.vector_store %arg6[%c0_12, %c0_13], %17 {strides = array<i32>} : memref<16x128xf32, #tpu.memory_space<vmem>>, vector<16x128xf32>,
    return
  }
  func.func @transform_0(%arg0: i32) -> (i32, i32) {
    %c0_i32 = arith.constant 0 : i32
    %c0_i32_0 = arith.constant 0 : i32
    return %c0_i32, %arg0 : i32, i32
  }
  func.func @transform_1(%arg0: i32) -> (i32, i32) {
    %c0_i32 = arith.constant 0 : i32
    %c0_i32_0 = arith.constant 0 : i32
    %c0_i32_1 = arith.constant 0 : i32
    return %c0_i32, %c0_i32_0 : i32, i32
  }
  func.func @transform_2(%arg0: i32) -> (i32, i32) {
    %c0_i32 = arith.constant 0 : i32
    %c0_i32_0 = arith.constant 0 : i32
    %c0_i32_1 = arith.constant 0 : i32
    return %c0_i32, %c0_i32_0 : i32, i32
  }
  func.func @transform_3(%arg0: i32) -> (i32, i32) {
    %c0_i32 = arith.constant 0 : i32
    %c0_i32_0 = arith.constant 0 : i32
    %c0_i32_1 = arith.constant 0 : i32
    return %c0_i32, %c0_i32_0 : i32, i32
  }
  func.func @transform_4(%arg0: i32) -> (i32, i32) {
    %c0_i32 = arith.constant 0 : i32
    %c0_i32_0 = arith.constant 0 : i32
    %c0_i32_1 = arith.constant 0 : i32
    return %c0_i32, %c0_i32_0 : i32, i32
  }
  func.func @transform_5(%arg0: i32) -> (i32, i32) {
    %c0_i32 = arith.constant 0 : i32
    %c0_i32_0 = arith.constant 0 : i32
    return %c0_i32, %arg0 : i32, i32
  }
}

</mosaic_0001>

<bundles_post_ra>
// kernel: residual_block_forward.1
= control target key start
LH: loop header
LB: loop body
LE: loop exit
PB: predicated region body
PF: predicated region fallthrough
CT: control target
= control target key end

     0   :  { %v191_v0 = vmov 0.0   ;;  %vm192_vm0 = vmmov 0   ;;  %v193_v4 = vmov 0   ;;  %vm43_vm1 = vcmask 130048   ;;  %s256_s0 = inlined_call_operand.vmem [shape: f32[16,128], index: 0, kind: input, shape index: {}]   ;;  %s257_s1 = inlined_call_operand.vmem [shape: bf16[16,16], index: 1, kind: input, shape index: {}]   ;;  %s258_s2 = inlined_call_operand.vmem [shape: f32[16,1], index: 2, kind: input, shape index: {}]   ;;  %s259_s3 = inlined_call_operand.vmem [shape: bf16[16,16], index: 3, kind: input, shape index: {}]   ;;  %s260_s4 = inlined_call_operand.vmem [shape: f32[16,1], index: 4, kind: input, shape index: {}]   ;;  %s261_s5 = inlined_call_operand.vmem [shape: f32[16,128], index: 5, kind: output, shape index: {}]  }
   0x1   :  { %172 = vmatprep.subr.bf16.mxu0 %v191_v0  ;;  %v21_v1 = vld [vmem:[%s256_s0] sm:$0xff]  ;;  %v22_v2 = vld [vmem:[%s256_s0 + $0x8] sm:$0xff]  ;;  %174 = vmatprep.mubr.msk.bf16.mxu0 %vm192_vm0, %v191_v0 }
   0x2   :  { %v25_v3 = vpack.c.bf16 %v22_v2, %v21_v1  ;;  %187 = vset.pattern.permute.xlu0 %v193_v4  ;;  %v26_v5 = vld [vmem:[%s258_s2] sm:$0xff]  ;;  %178 = vmatprep.subr.bf16.mxu1 %v191_v0  ;;  %v27_v7 = vld [vmem:[%s258_s2 + $0x8] sm:$0xff] }
   0x3   :  { %v189_v6 = vld [vmem:[%s257_s1] sm:$0xff]   ;;  %30 = vperm.xlu0 %187, %v26_v5   ;;  %180 = vmatprep.mubr.msk.bf16.mxu1 %vm192_vm0, %v191_v0  ;;  %v94_v9 = vld [vmem:[%s260_s4 + $0x8] sm:$0xff] }
   0x4   :  { %173 = vmatpush3.bf16.msra.mxu0 %v25_v3  ;;  %188 = vset.pattern.permute.xlu1 %v193_v4  ;;  %v93_v8 = vld [vmem:[%s260_s4] sm:$0xff] }
   0x5   :  { %97 = vperm.xlu1 %188, %v93_v8   ;;  %v190_v21 = vld [vmem:[%s259_s3] sm:$0xff]  }
   0x7   :  { %175 = vmatmul.mubr.msk.bf16.vlgmr.msra.gmra.mxu0 %vm43_vm1, %v189_v6  ;;  %35 = vperm.xlu0 %187, %v27_v7  }
   0x9   :  { %102 = vperm.xlu1 %188, %v94_v9  }
  0x7e   :  { %v31_v10 = vpop.permute.xlu0 %30 }
  0x80   :  { %v98_v22 = vpop.permute.xlu1 %97 }
  0x82   :  { %v36_v14 = vpop.permute.xlu0 %35 }
  0x84   :  { %v103_v27 = vpop.permute.xlu1 %102 }
  0xc7   :  { %v81_v11 = vpop.f32.mrf.mxu0 }
  0xc8   :  { %v82_v13 = vadd.f32 %v81_v11, %v31_v10 }
  0xc9   :  { %v176_v12 = vpop.f32.mrf.mxu0 }
  0xca   :  { %v88_v18 = vmax.f32 %v82_v13, 0.0 }
  0xcb   :  { %v84_v15 = vpop.f32.mrf.mxu0 }
  0xcc   :  { %v85_v16 = vadd.f32 %v84_v15, %v36_v14 }
  0xcd   :  { %v177_v17 = vpop.f32.mrf.mxu0 }
  0xce   :  { %v89_v19 = vmax.f32 %v85_v16, 0.0 }
  0xd0   :  { %v92_v20 = vpack.c.bf16 %v89_v19, %v88_v18 }
  0xd2   :  { %179 = vmatpush3.bf16.msra.mxu1 %v92_v20 }
  0xd5   :  { %181 = vmatmul.mubr.msk.bf16.vlgmr.msra.gmra.mxu1 %vm43_vm1, %v190_v21 }
 0x195   :  { %v147_v23 = vpop.f32.mrf.mxu1 }
 0x196   :  { %v148_v24 = vadd.f32 %v147_v23, %v98_v22 }
 0x197   :  { %v182_v25 = vpop.f32.mrf.mxu1 }
 0x198   :  { %v154_v26 = vadd.f32 %v148_v24, %v21_v1 }
 0x199   :  { %v150_v28 = vpop.f32.mrf.mxu1 }
 0x19a   :  { %v156_v29 = vmax.f32 %v154_v26, 0.0  ;;  %v151_v30 = vadd.f32 %v150_v28, %v103_v27 }
 0x19b   :  { %v183_v31 = vpop.f32.mrf.mxu1 }
 0x19c   :  { %158 = vst [vmem:[%s261_s5] sm:$0xff] %v156_v29  ;;  %v155_v32 = vadd.f32 %v151_v30, %v22_v2 }
 0x19e   :  { %v157_v33 = vmax.f32 %v155_v32, 0.0 }
 0x1a0   :  { %159 = vst [vmem:[%s261_s5 + $0x8] sm:$0xff] %v157_v33 }

</bundles_post_ra>
